<compile_context>
chip_gen: v7x
topology: tpu7x:2x2x1
jax: 0.10.0
libtpu: 0.0.40
codegen_flags: <defaults>
</compile_context>

<pallas_src>
import math
from functools import partial

import jax
import jax.numpy as jnp
from jax.experimental import pallas as pl
from jax.experimental.pallas import tpu as pltpu


def _round_up(v, m):
    return ((v + m - 1) // m) * m


def _pick_tile(dim, align, cap):
    """Largest multiple of `align` that divides `dim` and is <= cap.

    `dim` is assumed to already be a multiple of `align`.
    """
    best = align
    d = align
    limit = min(dim, cap)
    while d <= limit:
        if dim % d == 0:
            best = d
        d += align
    return best


def linear_kernel(x_ref, w_ref, b_ref, o_ref):
    # x_ref: [tm, tk]   w_ref: [tk, tn] (weight pre-relaid to K-major [IN, OUT])
    # b_ref: [1, tn]    o_ref: [tm, tn] f32, resident across the k axis.
    k = pl.program_id(2)

    @pl.when(k == 0)
    def _init():
        o_ref[...] = jnp.zeros_like(o_ref)

    # MXU matmul in natural layout; accumulate directly into the resident
    # f32 output block (no separate accumulator scratch / epilogue copy).
    o_ref[...] += jnp.dot(
        x_ref[...], w_ref[...], preferred_element_type=jnp.float32
    )

    @pl.when(k == pl.num_programs(2) - 1)
    def _finalize():
        o_ref[...] += b_ref[...]


def prepare_params(weight, bias):
    """One-time parameter relayout (do this at setup, not per forward):
    weight [OUT, IN] -> zero-padded K-major w_p [Kp, Np]; bias -> [1, Np]."""
    OUT, IN = weight.shape
    Kp = _round_up(IN, 128)
    Np = _round_up(OUT, 128)
    w_t = weight.T  # [IN, OUT]
    w_p = jnp.pad(w_t, ((0, Kp - IN), (0, Np - OUT))) if (Kp != IN or Np != OUT) else w_t
    b_p = jnp.pad(bias, (0, Np - OUT)).reshape(1, Np)
    return w_p, b_p


@partial(jax.jit, static_argnames=("out_features",))
def linear_forward(x, w_p, b_p, out_features):
    """x: [B, IN]; w_p: [Kp, Np] (prepped, K-major, zero-padded);
    b_p: [1, Np]; returns [B, out_features]."""
    B, IN = x.shape
    Kp, Np = w_p.shape
    assert Kp == _round_up(IN, 128), "w_p was prepared for a different IN"
    OUT = out_features

    Mp = _round_up(B, 8)

    # Tile sizes: aligned divisors of the (minimally) padded dims, capped for a
    # generation-safe double-buffered VMEM budget (~10 MiB at the caps).
    tm = _pick_tile(Mp, 8, 512)
    tn = _pick_tile(Np, 128, 512)
    tk = _pick_tile(Kp, 128, 1024)

    # Megacore (v7x has 2 TCs): make sure at least one "parallel" axis has >=2
    # blocks when the output grid would otherwise collapse to a single tile.
    if (Mp // tm) * (Np // tn) == 1:
        if Mp % 16 == 0:          # tm = Mp/2 stays 8-aligned and divides Mp
            tm = Mp // 2
        elif Np % 256 == 0:       # tn = Np/2 stays 128-aligned and divides Np
            tn = Np // 2

    # Pad x only to the (8,128)-aligned shape (zeros in the padded K region
    # keep the reduction exact).
    x_p = jnp.pad(x, ((0, Mp - B), (0, Kp - IN))) if (Mp != B or Kp != IN) else x

    grid = (Mp // tm, Np // tn, Kp // tk)

    cost = pl.CostEstimate(
        flops=2 * B * IN * OUT,
        transcendentals=0,
        bytes_accessed=(B * IN + IN * OUT + OUT + B * OUT) * x.dtype.itemsize,
    )

    out_p = pl.pallas_call(
        linear_kernel,
        out_shape=jax.ShapeDtypeStruct((Mp, Np), jnp.float32),
        grid_spec=pltpu.PrefetchScalarGridSpec(
            num_scalar_prefetch=0,
            grid=grid,
            in_specs=[
                pl.BlockSpec((tm, tk), lambda i, j, k: (i, k)),   # x tile
                pl.BlockSpec((tk, tn), lambda i, j, k: (k, j)),   # w (K-major) tile
                pl.BlockSpec((1, tn), lambda i, j, k: (0, j)),    # bias tile
            ],
            out_specs=pl.BlockSpec((tm, tn), lambda i, j, k: (i, j)),
        ),
        compiler_params=pltpu.CompilerParams(
            dimension_semantics=("parallel", "parallel", "arbitrary"),
            vmem_limit_bytes=32 * 1024 * 1024,
        ),
        cost_estimate=cost,
    )(x_p, w_p, b_p)

    # Slice away the alignment padding (fused under jit).
    return out_p[:B, :OUT].astype(x.dtype)


def custom_basic_nn_forward(x, weight, bias):
    """Convenience path matching the PyTorch module signature:
    x: [B, IN], weight: [OUT, IN], bias: [OUT] -> [B, OUT].
    For repeated calls, call prepare_params() once and use linear_forward()."""
    w_p, b_p = prepare_params(weight, bias)
    return linear_forward(x, w_p, b_p, out_features=weight.shape[0])


def init_params(key, input_shape, output_shape, dtype=jnp.float32):
    """Deterministic re-implementation of the PyTorch reset_parameters():
    kaiming_uniform_(weight, a=sqrt(5)) then uniform bias in
    [-1/sqrt(fan_in), 1/sqrt(fan_in)]."""
    k_w, k_b = jax.random.split(key)
    fan_in = input_shape
    gain = math.sqrt(2.0 / (1.0 + 5.0))  # a = sqrt(5) -> gain = sqrt(2/(1+a^2))
    w_bound = gain * math.sqrt(3.0 / fan_in)
    weight = jax.random.uniform(
        k_w, (output_shape, input_shape), dtype=dtype, minval=-w_bound, maxval=w_bound
    )
    b_bound = 1.0 / math.sqrt(fan_in) if fan_in > 0 else 0.0
    bias = jax.random.uniform(
        k_b, (output_shape,), dtype=dtype, minval=-b_bound, maxval=b_bound
    )
    return weight, bias


if __name__ == "__main__":
    key = jax.random.PRNGKey(0)
    k_params, k_x, k_params2, k_x2 = jax.random.split(key, 4)

    # --- Case 1: the module's toy size (launch/padding bound, but must be exact).
    batch, input_shape, output_shape = 8, 32, 16
    weight, bias = init_params(k_params, input_shape, output_shape)
    x = jax.random.normal(k_x, (batch, input_shape), dtype=jnp.float32)

    w_p, b_p = prepare_params(weight, bias)          # one-time relayout
    out = linear_forward(x, w_p, b_p, out_features=output_shape)
    out = jax.block_until_ready(out)
    ref = x @ weight.T + bias
    assert out.shape == (batch, output_shape)
    assert jnp.allclose(out, ref, atol=1e-5, rtol=1e-5)

    # --- Case 2: non-tile-multiple shape exercising minimal padding, a multi-block
    # grid (megacore split on M) and the padding slice.
    b2, in2, out2 = 320, 640, 384
    weight2, bias2 = init_params(k_params2, in2, out2)
    x2 = jax.random.normal(k_x2, (b2, in2), dtype=jnp.float32)

    w2_p, b2_p = prepare_params(weight2, bias2)
    o2 = linear_forward(x2, w2_p, b2_p, out_features=out2)
    o2 = jax.block_until_ready(o2)
    ref2 = x2 @ weight2.T + bias2
    assert o2.shape == (b2, out2)
    assert jnp.allclose(o2, ref2, atol=1e-4, rtol=1e-4)

    print("KERNEL_OK")
</pallas_src>

<mosaic_0001>
module attributes {stable_mosaic.version = 11 : i64} {
  func.func @linear_kernel(%arg0: i32, %arg1: i32, %arg2: i32, %arg3: memref<8x128xf32, #tpu.memory_space<vmem>>, %arg4: memref<128x128xf32, #tpu.memory_space<vmem>>, %arg5: memref<1x128xf32, #tpu.memory_space<vmem>>, %arg6: memref<8x128xf32, #tpu.memory_space<vmem>>) attributes {dimension_semantics = [#tpu.dimension_semantics<parallel>, #tpu.dimension_semantics<parallel>, #tpu.dimension_semantics<arbitrary>], iteration_bounds = array<i64: 1, 1, 1>, scalar_prefetch = 0 : i64, scratch_operands = 0 : i64, tpu.core_type = #tpu.core_type<tc>, window_params = [{transform_indices = @transform_0, window_bounds = array<i64: 8, 128>}, {transform_indices = @transform_1, window_bounds = array<i64: 128, 128>}, {transform_indices = @transform_2, window_bounds = array<i64: 1, 128>}, {transform_indices = @transform_3, window_bounds = array<i64: 8, 128>}]} {
    %c0_i32 = arith.constant 0 : i32
    %0 = arith.cmpi eq, %arg2, %c0_i32 : i32
    %1 = arith.extui %0 : i1 to i32
    %c0_i32_0 = arith.constant 0 : i32
    %2 = arith.cmpi ne, %1, %c0_i32_0 : i32
    scf.if %2 {
      %cst_10 = arith.constant 0.000000e+00 : f32
      %12 = vector.broadcast %cst_10 : f32 to vector<8x128xf32>
      %c0_11 = arith.constant 0 : index
      %c0_12 = arith.constant 0 : index
      %13 = vector.load %arg6[%c0_11, %c0_12] : memref<8x128xf32, #tpu.memory_space<vmem>>, vector<8x128xf32>
      tpu.vector_store %arg6[%c0_11, %c0_12], %12 {strides = array<i32>} : memref<8x128xf32, #tpu.memory_space<vmem>>, vector<8x128xf32>,
    } else {
    }
    %c0 = arith.constant 0 : index
    %c0_1 = arith.constant 0 : index
    %3 = vector.load %arg6[%c0, %c0_1] : memref<8x128xf32, #tpu.memory_space<vmem>>, vector<8x128xf32>
    %c0_2 = arith.constant 0 : index
    %c0_3 = arith.constant 0 : index
    %4 = vector.load %arg3[%c0_2, %c0_3] : memref<8x128xf32, #tpu.memory_space<vmem>>, vector<8x128xf32>
    %c0_4 = arith.constant 0 : index
    %c0_5 = arith.constant 0 : index
    %5 = vector.load %arg4[%c0_4, %c0_5] : memref<128x128xf32, #tpu.memory_space<vmem>>, vector<128x128xf32>
    %cst = arith.constant dense<0.000000e+00> : vector<8x128xf32>
    %6 = tpu.matmul %4, %5, %cst {dimension_numbers = #tpu.dot_dimension_numbers<[1], [0], [0], [1], [0, 0, 1, 1], [], []>} : vector<8x128xf32>, vector<128x128xf32>, vector<8x128xf32> -> vector<8x128xf32>
    %7 = arith.addf %3, %6 : vector<8x128xf32>
    %c0_6 = arith.constant 0 : index
    %c0_7 = arith.constant 0 : index
    %8 = vector.load %arg6[%c0_6, %c0_7] : memref<8x128xf32, #tpu.memory_space<vmem>>, vector<8x128xf32>
    tpu.vector_store %arg6[%c0_6, %c0_7], %7 {strides = array<i32>} : memref<8x128xf32, #tpu.memory_space<vmem>>, vector<8x128xf32>,
    %c0_i32_8 = arith.constant 0 : i32
    %9 = arith.cmpi eq, %arg2, %c0_i32_8 : i32
    %10 = arith.extui %9 : i1 to i32
    %c0_i32_9 = arith.constant 0 : i32
    %11 = arith.cmpi ne, %10, %c0_i32_9 : i32
    scf.if %11 {
      %c0_10 = arith.constant 0 : index
      %c0_11 = arith.constant 0 : index
      %12 = vector.load %arg6[%c0_10, %c0_11] : memref<8x128xf32, #tpu.memory_space<vmem>>, vector<8x128xf32>
      %c0_12 = arith.constant 0 : index
      %c0_13 = arith.constant 0 : index
      %13 = vector.load %arg5[%c0_12, %c0_13] : memref<1x128xf32, #tpu.memory_space<vmem>>, vector<1x128xf32>
      %14 = vector.broadcast %13 : vector<1x128xf32> to vector<8x128xf32>
      %15 = arith.addf %12, %14 : vector<8x128xf32>
      %c0_14 = arith.constant 0 : index
      %c0_15 = arith.constant 0 : index
      %16 = vector.load %arg6[%c0_14, %c0_15] : memref<8x128xf32, #tpu.memory_space<vmem>>, vector<8x128xf32>
      tpu.vector_store %arg6[%c0_14, %c0_15], %15 {strides = array<i32>} : memref<8x128xf32, #tpu.memory_space<vmem>>, vector<8x128xf32>,
    } else {
    }
    return
  }
  func.func @transform_0(%arg0: i32, %arg1: i32, %arg2: i32) -> (i32, i32) {
    %c0_i32 = arith.constant 0 : i32
    return %arg0, %arg2 : i32, i32
  }
  func.func @transform_1(%arg0: i32, %arg1: i32, %arg2: i32) -> (i32, i32) {
    %c0_i32 = arith.constant 0 : i32
    return %arg2, %arg1 : i32, i32
  }
  func.func @transform_2(%arg0: i32, %arg1: i32, %arg2: i32) -> (i32, i32) {
    %c0_i32 = arith.constant 0 : i32
    %c0_i32_0 = arith.constant 0 : i32
    return %c0_i32, %arg1 : i32, i32
  }
  func.func @transform_3(%arg0: i32, %arg1: i32, %arg2: i32) -> (i32, i32) {
    %c0_i32 = arith.constant 0 : i32
    return %arg0, %arg1 : i32, i32
  }
}

</mosaic_0001>

<bundles_post_ra>
// kernel: linear_forward.1
= control target key start
LH: loop header
LB: loop body
LE: loop exit
PB: predicated region body
PF: predicated region fallthrough
CT: control target
= control target key end

     0   :  { %8 = vsyncpa [#allocation3], 0  ;;  %s341_s0 = inlined_call_operand.vmem [shape: f32[8,128], index: 0, kind: input, shape index: {}]   ;;  %s342_s1 = inlined_call_operand.hbm [shape: f32[128,128], index: 1, kind: input, shape index: {}]   ;;  %s343_s2 = inlined_call_operand.vmem [shape: f32[1,128], index: 2, kind: input, shape index: {}]   ;;  %s344_s3 = inlined_call_operand.hbm [shape: f32[8,128], index: 3, kind: output, shape index: {}]  }
   0x1   :  { %9 = vsyncpa [#allocation4], 0  ;;  %s284_s12 = smov [#allocation2]   ;;  %s236_s16 = scalar_lea.hbm %s342_s1, 2048 }
   0x2   :  { %s17_s13 = sshll.u32 %s284_s12, 4  ;;  %p237_p0 = scmp.ne.s32.totalorder %s342_s1, %s236_s16  ;;  %s18_s13 = int_to_ptr.vmem [resolvable:$true] %s17_s13 }
   0x3   :  { %p240_p1 = scmp.lt.u32.totalorder %s236_s16, %s342_s1 }
   0x5   :  { %p242_p2 = pnand %p240_p1, %p237_p0 }
   0x7   :  { %245 = shalt.err (!%p242_p2)
}
   0x8   :  { %s246_s21 = scalar_lea.vmem %s18_s13, 2048  ;;  %p251_p4 = scmp.lt.s32.totalorder %s18_s13, %s18_s13 }
   0x9   :  { %p247_p3 = scmp.ne.s32.totalorder %s18_s13, %s246_s21  ;;  %p252_p5 = scmp.lt.s32.totalorder %s246_s21, %s246_s21 }
   0xb   :  { %p253_p6 = por %p252_p5, %p251_p4 }
   0xd   :  { %p254_p7 = pnand %p253_p6, %p247_p3 }
   0xf   :  { %257 = shalt.err (!%p254_p7)
}
  0x10   :  { %s285_s22 = smov 128   ;;  %s286_s23 = smov 8  }
  0x11   :  { %23 = dma.hbm_to_vmem [thread:$0]  %s342_s1, 2048, %s18_s13, [#allocation3], %s285_s22, %s285_s22, %s286_s23  }
  0x12   :  { %280 = dma.done.wait [#allocation3], 2048  }
  0x13   :  { %281 = vsyncadd [#allocation3], 4294965248  ;;  %v287_v0 = vmov 0.0|0.0   ;;  %vm288_vm0 = vmmov 0   ;;  %v289_v1 = vmov 0.0   ;;  %v36_v2 = vld [vmem:[#allocation2] sm:$0xff] }
  0x14   :  { %205 = vmatprep.subr.bf16.mxu0 %v287_v0  ;;  %202 = vmatprep.mubr.msk.f32.mxu0 %vm288_vm0, %v289_v1  ;;  %v37_v3 = vld [vmem:[#allocation2 + $0x8] sm:$0xff]  ;;  %v38_v4 = vld [vmem:[#allocation2 + $0x10] sm:$0xff]  ;;  %v39_v6 = vld [vmem:[#allocation2 + $0x18] sm:$0xff]  ;;  %s290_s29 = smov [#allocation5]  }
  0x15   :  { %v206_v5 = vpack.c.bf16 %v37_v3, %v36_v2  ;;  %v209_v7 = vpack.c.bf16 %v39_v6, %v38_v4  ;;  %v40_v8 = vld [vmem:[#allocation2 + $0x20] sm:$0xff]  ;;  %v41_v9 = vld [vmem:[#allocation2 + $0x28] sm:$0xff]  ;;  %v42_v11 = vld [vmem:[#allocation2 + $0x30] sm:$0xff]  ;;  %s143_s30 = sshll.u32 %s290_s29, 4  ;;  %s144_s30 = int_to_ptr.vmem [resolvable:$true] %s143_s30 }
  0x16   :  { %v212_v10 = vpack.c.bf16 %v41_v9, %v40_v8  ;;  %v43_v12 = vld [vmem:[#allocation2 + $0x38] sm:$0xff]  ;;  %v44_v14 = vld [vmem:[#allocation2 + $0x40] sm:$0xff]  ;;  %v45_v15 = vld [vmem:[#allocation2 + $0x48] sm:$0xff]  ;;  %s258_s4 = scalar_lea.vmem %s144_s30, 128  ;;  %p263_p9 = scmp.lt.s32.totalorder %s144_s30, %s144_s30 }
  0x17   :  { %207 = vmatpush3.bf16.msra.mxu0 %v206_v5  ;;  %v215_v13 = vpack.c.bf16 %v43_v12, %v42_v11  ;;  %v218_v16 = vpack.c.bf16 %v45_v15, %v44_v14  ;;  %v46_v17 = vld [vmem:[#allocation2 + $0x50] sm:$0xff]  ;;  %v47_v18 = vld [vmem:[#allocation2 + $0x58] sm:$0xff]  ;;  %v48_v20 = vld [vmem:[#allocation2 + $0x60] sm:$0xff]  ;;  %p259_p8 = scmp.ne.s32.totalorder %s144_s30, %s258_s4  ;;  %p264_p10 = scmp.lt.s32.totalorder %s258_s4, %s258_s4 }
  0x18   :  { %208 = vmatprep.subr.bf16.mxu0 %v287_v0  ;;  %v221_v19 = vpack.c.bf16 %v47_v18, %v46_v17  ;;  %v49_v21 = vld [vmem:[#allocation2 + $0x68] sm:$0xff]  ;;  %v50_v23 = vld [vmem:[#allocation2 + $0x70] sm:$0xff]  ;;  %v51_v24 = vld [vmem:[#allocation2 + $0x78] sm:$0xff] }
  0x19   :  { %v224_v22 = vpack.c.bf16 %v49_v21, %v48_v20  ;;  %v227_v25 = vpack.c.bf16 %v51_v24, %v50_v23  ;;  %v35_v26 = vld [vmem:[%s341_s0] sm:$0xff]  ;;  %p265_p11 = por %p264_p10, %p263_p9 }
  0x1a   :  { %v152_v28 = vld [vmem:[%s343_s2] ss:$0 sm:$0xff] }
  0x1b   :  { %210 = vmatpush3.bf16.msra.mxu0 %v209_v7  ;;  %p266_p12 = pnand %p265_p11, %p259_p8 }
  0x1c   :  { %211 = vmatprep.subr.bf16.mxu0 %v287_v0 }
  0x1f   :  { %213 = vmatpush3.bf16.msra.mxu0 %v212_v10 }
  0x20   :  { %214 = vmatprep.subr.bf16.mxu0 %v287_v0 }
  0x23   :  { %216 = vmatpush3.bf16.msra.mxu0 %v215_v13 }
  0x24   :  { %217 = vmatprep.subr.bf16.mxu0 %v287_v0 }
  0x27   :  { %219 = vmatpush3.bf16.msra.mxu0 %v218_v16 }
  0x28   :  { %220 = vmatprep.subr.bf16.mxu0 %v287_v0 }
  0x2b   :  { %222 = vmatpush3.bf16.msra.mxu0 %v221_v19 }
  0x2c   :  { %223 = vmatprep.subr.bf16.mxu0 %v287_v0 }
  0x2f   :  { %225 = vmatpush3.bf16.msra.mxu0 %v224_v22 }
  0x30   :  { %226 = vmatprep.subr.bf16.mxu0 %v287_v0 }
  0x33   :  { %228 = vmatpush3.bf16.msra.mxu0 %v227_v25 }
  0x36   :  { %203 = vmatmul.mubr.f32.vlgmr.msra.gmra.mrb[0].mxu0 %v35_v26 }
 0x109   :  { %v118_v27 = vpop.f32.mrb[0].mxu0 }
 0x10a   :  { %v204_v29 = vpop.f32.mrb[1].mxu0  ;;  %v135_v30 = vadd.f32 %v152_v28, %v118_v27 }
 0x10c   :  { %136 = vst [vmem:[#allocation5] sm:$0xff] %v135_v30 }
 0x10d   :  { %269 = shalt.err (!%p266_p12)
}
 0x10e   :  { %s270_s6 = scalar_lea.hbm %s344_s3, 128 }
 0x10f   :  { %p271_p13 = scmp.ne.s32.totalorder %s344_s3, %s270_s6  ;;  %p274_p0 = scmp.lt.u32.totalorder %s270_s6, %s344_s3 }
 0x111   :  { %p276_p1 = pnand %p274_p0, %p271_p13 }
 0x113   :  { %279 = shalt.err (!%p276_p1)
}
 0x114   :  { %146 = dma.vmem_to_hbm [thread:$0]  %s144_s30, 128, %s344_s3, [#allocation4]  }
 0x115   :  { %282 = dma.done.wait [#allocation4], 128  }
 0x116   :  { %283 = vsyncadd [#allocation4], 4294967168 }
 0x117   :  { %150 = vsyncpa [#allocation3], 1 }
 0x118   :  { %151 = vsyncpa [#allocation4], 1 }

</bundles_post_ra>
